<compile_context>
chip_gen: v7x
topology: tpu7x:2x2x1
jax: 0.10.0
libtpu: 0.0.40
codegen_flags: <defaults>
</compile_context>

<pallas_src>
import functools

import jax
import jax.numpy as jnp
from jax.experimental import pallas as pl
from jax.experimental.pallas import tpu as pltpu


def _round_up(a: int, b: int) -> int:
    return (a + b - 1) // b * b


_TARGET_BLOCK_BYTES = 2 << 20  # ~2 MiB per input block per step


def hist_kernel(x_ref, uk_ref, wk_ref, o_ref, acc_ref, *, tile, last_cols):
    # x_ref  : [tn, tile]      input tile (native dtype)
    # uk_ref : [1, NB]         f32
    # wk_ref : [1, NB]         f32
    # o_ref  : [tn, NB]        f32 (same block across the reduction axis)
    # acc_ref: [tn, acc_w]     f32 VMEM scratch accumulator (acc_w = min(128, tile))
    k = pl.program_id(1)
    nk = pl.num_programs(1)

    @pl.when(k == 0)
    def _init():
        acc_ref[...] = jnp.zeros_like(acc_ref)

    def fold(cols):
        # Fold the first `cols` columns of the current tile into the
        # accumulator using lane-aligned static ref slices (per-chunk loads,
        # bounded live range; pure VALU adds, no XLU in the hot loop).
        full, rem = cols // 128, cols % 128
        for j in range(full):
            acc_ref[...] += x_ref[:, j * 128:(j + 1) * 128].astype(jnp.float32)
        if rem:
            off = full * 128
            acc_ref[:, :rem] += x_ref[:, off:off + rem].astype(jnp.float32)

    if last_cols == tile:
        # Every reduction step is a full tile (tile divides F, or single step).
        fold(tile)
    else:
        # Ragged final reduction block: only its first `last_cols` columns are
        # valid data; the rest of the VMEM buffer is never read.
        @pl.when(k < nk - 1)
        def _full_step():
            fold(tile)

        @pl.when(k == nk - 1)
        def _tail_step():
            fold(last_cols)

    @pl.when(k == nk - 1)
    def _epilogue():
        # Single cross-lane reduce + tiny [tn, NB] epilogue, all in f32.
        s = jnp.sum(acc_ref[...], axis=-1, keepdims=True)       # [tn, 1]
        y1 = s - uk_ref[...]                                     # [tn, NB]
        row = jnp.sum(jnp.abs(y1), axis=-1, keepdims=True)       # [tn, 1]
        y2 = wk_ref[...] - row                                   # [tn, NB]
        # relu(exp(y2) - 1) + 1  ==  max(exp(y2), 1)
        o_ref[...] = jnp.maximum(jnp.exp(y2), 1.0)


def _pick_row_tile(n: int, cap: int) -> int:
    """Multiple-of-8 row tile; prefers >=2 row tiles (v7x megacore)."""
    if n < 8:
        return n  # block dim equals the full array dim -> allowed
    tn = 8
    for cand in (128, 64, 32, 16, 8):
        if cand <= min(n, cap):
            tn = cand
            break
    while tn > 8 and pl.cdiv(n, tn) < 2:
        tn //= 2
    return tn


def hist_layer(x, uk, wk, *, lane_tile=None, row_tile=128):
    """x: [N, C, L] (any float dtype), uk/wk: [N] -> [N, N, 1] float32."""
    N, C, L = x.shape
    NB = uk.shape[0]
    F = C * L
    itemsize = int(jnp.dtype(x.dtype).itemsize)

    # Row tile: multiple of 8 (or == N when N < 8), ragged last block is fine
    # (Pallas only DMAs / writes back the valid rows).
    tn = _pick_row_tile(N, row_tile)

    # Reduction tile: ~2 MiB per input block unless overridden; multiple of
    # 128 (or == F when F fits in one step).  No wrapper-side padding of F.
    if lane_tile is None:
        lane_tile = max(512, _TARGET_BLOCK_BYTES // max(tn * itemsize, 1))
    lane_tile = max(128, _round_up(int(lane_tile), 128))
    tile = F if F <= lane_tile else lane_tile

    nk = pl.cdiv(F, tile)
    last_cols = F - (nk - 1) * tile          # valid columns in the last step
    grid = (pl.cdiv(N, tn), nk)
    acc_w = min(128, tile)

    x2d = x.reshape(N, F)                    # free reshape: no HBM copy, no pad
    uk2d = uk.reshape(1, NB).astype(jnp.float32)
    wk2d = wk.reshape(1, NB).astype(jnp.float32)

    # Explicit VMEM budget: double-buffered input + output, accumulator,
    # uk/wk, plus headroom.  Safe on v5e's 16 MiB scoped default and within
    # v7x's 64 MiB physical VMEM.
    vmem_need = (2 * tn * tile * itemsize
                 + 2 * tn * max(NB, 128) * 4
                 + tn * acc_w * 4
                 + 4 * max(NB, 128) * 4)
    vmem_limit = int(min(max(32 << 20, vmem_need + (4 << 20)), 64 << 20))

    cost = pl.CostEstimate(
        flops=2 * N * F + 5 * N * NB,
        transcendentals=N * NB,
        bytes_accessed=N * F * itemsize + N * NB * 4 + 2 * NB * 4,
    )

    kern = functools.partial(hist_kernel, tile=tile, last_cols=last_cols)
    out2d = pl.pallas_call(
        kern,
        out_shape=jax.ShapeDtypeStruct((N, NB), jnp.float32),
        grid=grid,
        in_specs=[
            pl.BlockSpec((tn, tile), lambda i, k: (i, k)),
            pl.BlockSpec((1, NB), lambda i, k: (0, 0)),
            pl.BlockSpec((1, NB), lambda i, k: (0, 0)),
        ],
        out_specs=pl.BlockSpec((tn, NB), lambda i, k: (i, 0)),
        scratch_shapes=[pltpu.VMEM((tn, acc_w), jnp.float32)],
        compiler_params=pltpu.CompilerParams(
            dimension_semantics=("parallel", "arbitrary"),
            vmem_limit_bytes=vmem_limit,
        ),
        cost_estimate=cost,
    )(x2d, uk2d, wk2d)

    # conv1d with a kernel covering the whole length -> output spatial dim 1.
    return out2d.reshape(N, NB, 1)


def hist_layer_ref(x, uk, wk):
    """Pure-JAX reference of the literal PyTorch forward."""
    xf = x.astype(jnp.float32)
    s = jnp.sum(xf, axis=(1, 2))                                  # [N]
    y1 = s[:, None] - uk[None, :]                                 # [N, N]
    y2 = wk[None, :] - jnp.sum(jnp.abs(y1), axis=1, keepdims=True)
    e = jnp.exp(y2)
    out = jnp.maximum(e - 1.0, 0.0) + 1.0
    return out[:, :, None]


if __name__ == "__main__":
    key = jax.random.PRNGKey(0)
    k1, k2, k3 = jax.random.split(key, 3)

    # torch.nn.Parameter() carries no shape; the forward implies uk/wk are
    # per-output-channel biases of length N.  Deterministic init below.

    # Case 1: small shape (single reduction step, F = 64 < 128).
    N, C, L = 8, 4, 16
    x = jax.random.normal(k1, (N, C, L), dtype=jnp.float32)
    uk = jnp.linspace(-1.0, 1.0, N, dtype=jnp.float32)
    wk = jnp.linspace(0.1, 0.9, N, dtype=jnp.float32)
    out = jax.block_until_ready(hist_layer(x, uk, wk))
    assert out.shape == (N, N, 1)
    assert jnp.allclose(out, hist_layer_ref(x, uk, wk), rtol=1e-5, atol=1e-5)

    # Case 2: F = 1280 -> single-step tile == F, 10 full 128-lane chunks,
    # two row tiles of 8 rows (exercises the "parallel" row axis).
    N2, C2, L2 = 16, 8, 160
    x2 = jax.random.normal(k2, (N2, C2, L2), dtype=jnp.float32)
    uk2 = jnp.linspace(-2.0, 2.0, N2, dtype=jnp.float32)
    wk2 = jnp.linspace(0.05, 0.95, N2, dtype=jnp.float32)
    out2 = jax.block_until_ready(hist_layer(x2, uk2, wk2))
    assert out2.shape == (N2, N2, 1)
    assert jnp.allclose(out2, hist_layer_ref(x2, uk2, wk2), rtol=1e-5, atol=1e-5)

    # Case 3: forced multi-step ragged reduction: F = 1200, tile = 512 ->
    # 3 reduction steps, last step has 176 valid cols (1 full chunk + a
    # 48-lane tail), plus a ragged last row block (N = 12, tn = 8).
    N3, C3, L3 = 12, 8, 150
    x3 = jax.random.normal(k3, (N3, C3, L3), dtype=jnp.float32)
    uk3 = jnp.linspace(-1.5, 1.5, N3, dtype=jnp.float32)
    wk3 = jnp.linspace(0.2, 0.8, N3, dtype=jnp.float32)
    out3 = jax.block_until_ready(hist_layer(x3, uk3, wk3, lane_tile=512))
    assert out3.shape == (N3, N3, 1)
    assert jnp.allclose(out3, hist_layer_ref(x3, uk3, wk3), rtol=1e-5, atol=1e-5)

    print("KERNEL_OK")
</pallas_src>

<mosaic_0001>
module attributes {stable_mosaic.version = 11 : i64} {
  func.func @hist_kernel(%arg0: i32, %arg1: i32, %arg2: memref<8x64xf32, #tpu.memory_space<vmem>>, %arg3: memref<1x8xf32, #tpu.memory_space<vmem>>, %arg4: memref<1x8xf32, #tpu.memory_space<vmem>>, %arg5: memref<8x8xf32, #tpu.memory_space<vmem>>, %arg6: memref<8x64xf32, #tpu.memory_space<vmem>>) attributes {dimension_semantics = [#tpu.dimension_semantics<parallel>, #tpu.dimension_semantics<arbitrary>], iteration_bounds = array<i64: 1, 1>, scalar_prefetch = 0 : i64, scratch_operands = 1 : i64, tpu.core_type = #tpu.core_type<tc>, window_params = [{transform_indices = @transform_0, window_bounds = array<i64: 8, 64>}, {pipeline_mode = #tpu.pipeline_mode<synchronous>, transform_indices = @transform_1, window_bounds = array<i64: 1, 8>}, {pipeline_mode = #tpu.pipeline_mode<synchronous>, transform_indices = @transform_2, window_bounds = array<i64: 1, 8>}, {transform_indices = @transform_3, window_bounds = array<i64: 8, 8>}]} {
    %c0_i32 = arith.constant 0 : i32
    %0 = arith.cmpi eq, %arg1, %c0_i32 : i32
    %1 = arith.extui %0 : i1 to i32
    %c0_i32_0 = arith.constant 0 : i32
    %2 = arith.cmpi ne, %1, %c0_i32_0 : i32
    scf.if %2 {
      %cst = arith.constant 0.000000e+00 : f32
      %10 = vector.broadcast %cst : f32 to vector<8x64xf32>
      %c0_8 = arith.constant 0 : index
      %c0_9 = arith.constant 0 : index
      %11 = vector.load %arg6[%c0_8, %c0_9] : memref<8x64xf32, #tpu.memory_space<vmem>>, vector<8x64xf32>
      tpu.vector_store %arg6[%c0_8, %c0_9], %10 {strides = array<i32>} : memref<8x64xf32, #tpu.memory_space<vmem>>, vector<8x64xf32>,
    } else {
    }
    %c0 = arith.constant 0 : index
    %c0_1 = arith.constant 0 : index
    %3 = vector.load %arg6[%c0, %c0_1] : memref<8x64xf32, #tpu.memory_space<vmem>>, vector<8x64xf32>
    %c0_2 = arith.constant 0 : index
    %c0_3 = arith.constant 0 : index
    %4 = vector.load %arg2[%c0_2, %c0_3] : memref<8x64xf32, #tpu.memory_space<vmem>>, vector<8x64xf32>
    %5 = arith.addf %3, %4 : vector<8x64xf32>
    %c0_4 = arith.constant 0 : index
    %c0_5 = arith.constant 0 : index
    %6 = vector.load %arg6[%c0_4, %c0_5] : memref<8x64xf32, #tpu.memory_space<vmem>>, vector<8x64xf32>
    tpu.vector_store %arg6[%c0_4, %c0_5], %5 {strides = array<i32>} : memref<8x64xf32, #tpu.memory_space<vmem>>, vector<8x64xf32>,
    %c0_i32_6 = arith.constant 0 : i32
    %7 = arith.cmpi eq, %arg1, %c0_i32_6 : i32
    %8 = arith.extui %7 : i1 to i32
    %c0_i32_7 = arith.constant 0 : i32
    %9 = arith.cmpi ne, %8, %c0_i32_7 : i32
    scf.if %9 {
      %c0_8 = arith.constant 0 : index
      %c0_9 = arith.constant 0 : index
      %10 = vector.load %arg6[%c0_8, %c0_9] : memref<8x64xf32, #tpu.memory_space<vmem>>, vector<8x64xf32>
      %cst = arith.constant dense<0.000000e+00> : vector<8xf32>
      %11 = vector.multi_reduction <add>, %10, %cst [1] : vector<8x64xf32> to vector<8xf32>
      %12 = vector.shape_cast %11 : vector<8xf32> to vector<8x1xf32>
      %c0_10 = arith.constant 0 : index
      %c0_11 = arith.constant 0 : index
      %13 = vector.load %arg3[%c0_10, %c0_11] : memref<1x8xf32, #tpu.memory_space<vmem>>, vector<1x8xf32>
      %14 = vector.broadcast %12 : vector<8x1xf32> to vector<8x8xf32>
      %15 = vector.broadcast %13 : vector<1x8xf32> to vector<8x8xf32>
      %16 = arith.subf %14, %15 : vector<8x8xf32>
      %17 = math.absf %16 : vector<8x8xf32>
      %cst_12 = arith.constant dense<0.000000e+00> : vector<8xf32>
      %18 = vector.multi_reduction <add>, %17, %cst_12 [1] : vector<8x8xf32> to vector<8xf32>
      %19 = vector.shape_cast %18 : vector<8xf32> to vector<8x1xf32>
      %c0_13 = arith.constant 0 : index
      %c0_14 = arith.constant 0 : index
      %20 = vector.load %arg4[%c0_13, %c0_14] : memref<1x8xf32, #tpu.memory_space<vmem>>, vector<1x8xf32>
      %21 = vector.broadcast %20 : vector<1x8xf32> to vector<8x8xf32>
      %22 = vector.broadcast %19 : vector<8x1xf32> to vector<8x8xf32>
      %23 = arith.subf %21, %22 : vector<8x8xf32>
      %24 = math.exp %23 : vector<8x8xf32>
      %cst_15 = arith.constant 1.000000e+00 : f32
      %25 = vector.broadcast %cst_15 : f32 to vector<8x8xf32>
      %26 = arith.maximumf %24, %25 : vector<8x8xf32>
      %c0_16 = arith.constant 0 : index
      %c0_17 = arith.constant 0 : index
      %27 = vector.load %arg5[%c0_16, %c0_17] : memref<8x8xf32, #tpu.memory_space<vmem>>, vector<8x8xf32>
      tpu.vector_store %arg5[%c0_16, %c0_17], %26 {strides = array<i32>} : memref<8x8xf32, #tpu.memory_space<vmem>>, vector<8x8xf32>,
    } else {
    }
    return
  }
  func.func @transform_0(%arg0: i32, %arg1: i32) -> (i32, i32) {
    %c0_i32 = arith.constant 0 : i32
    return %arg0, %arg1 : i32, i32
  }
  func.func @transform_1(%arg0: i32, %arg1: i32) -> (i32, i32) {
    %c0_i32 = arith.constant 0 : i32
    %c0_i32_0 = arith.constant 0 : i32
    %c0_i32_1 = arith.constant 0 : i32
    return %c0_i32, %c0_i32_0 : i32, i32
  }
  func.func @transform_2(%arg0: i32, %arg1: i32) -> (i32, i32) {
    %c0_i32 = arith.constant 0 : i32
    %c0_i32_0 = arith.constant 0 : i32
    %c0_i32_1 = arith.constant 0 : i32
    return %c0_i32, %c0_i32_0 : i32, i32
  }
  func.func @transform_3(%arg0: i32, %arg1: i32) -> (i32, i32) {
    %c0_i32 = arith.constant 0 : i32
    %c0_i32_0 = arith.constant 0 : i32
    return %arg0, %c0_i32 : i32, i32
  }
}

</mosaic_0001>

<bundles_post_ra>
// kernel: tpu_custom_call.1
= control target key start
LH: loop header
LB: loop body
LE: loop exit
PB: predicated region body
PF: predicated region fallthrough
CT: control target
= control target key end

     0   :  { %8 = vsyncpa [#allocation4], 0  ;;  %s193_s0 = inlined_call_operand.hbm [shape: f32[8,64], index: 0, kind: input, shape index: {}]   ;;  %s194_s1 = inlined_call_operand.vmem [shape: f32[1,8], index: 1, kind: input, shape index: {}]   ;;  %s195_s2 = inlined_call_operand.vmem [shape: f32[1,8], index: 2, kind: input, shape index: {}]   ;;  %s196_s3 = inlined_call_operand.hbm [shape: f32[8,8], index: 3, kind: output, shape index: {}]  }
   0x1   :  { %9 = vsyncpa [#allocation5], 0  ;;  %s140_s12 = smov [#allocation3]   ;;  %s92_s16 = scalar_lea.hbm %s193_s0, 128 }
   0x2   :  { %s16_s13 = sshll.u32 %s140_s12, 4  ;;  %p93_p0 = scmp.ne.s32.totalorder %s193_s0, %s92_s16  ;;  %s17_s13 = int_to_ptr.vmem [resolvable:$true] %s16_s13 }
   0x3   :  { %p96_p1 = scmp.lt.u32.totalorder %s92_s16, %s193_s0 }
   0x5   :  { %p98_p2 = pnand %p96_p1, %p93_p0 }
   0x7   :  { %101 = shalt.err (!%p98_p2)
}
   0x8   :  { %s102_s21 = scalar_lea.vmem %s17_s13, 128  ;;  %p107_p4 = scmp.lt.s32.totalorder %s17_s13, %s17_s13 }
   0x9   :  { %p103_p3 = scmp.ne.s32.totalorder %s17_s13, %s102_s21  ;;  %p108_p5 = scmp.lt.s32.totalorder %s102_s21, %s102_s21 }
   0xb   :  { %p109_p6 = por %p108_p5, %p107_p4 }
   0xd   :  { %p110_p7 = pnand %p109_p6, %p103_p3 }
   0xf   :  { %113 = shalt.err (!%p110_p7)
}
  0x10   :  { %19 = dma.hbm_to_vmem [thread:$0]  %s193_s0, 128, %s17_s13, [#allocation4]  }
  0x11   :  { %136 = dma.done.wait [#allocation4], 128  }
  0x12   :  { %137 = vsyncadd [#allocation4], 4294967168  ;;  %vm31_vm0 = vcmask 523264   ;;  %v141_v0 = vmov 0.0   ;;  %v34_v1 = vld [vmem:[#allocation3] sm:$0xff]  ;;  %vm54_vm1 = vcmask 64512  }
  0x13   :  { %32 = vst.msk [vmem:[#allocation2] sm:$0xff] %vm31_vm0, %v141_v0  ;;  %v85_v6 = vld [vmem:[%s194_s1] ss:$0 sm:$0xff]  ;;  %s142_s27 = smov [#allocation6]  }
  0x14   :  { %v86_v11 = vld [vmem:[%s195_s2] ss:$0 sm:$0xff]  ;;  %s76_s28 = sshll.u32 %s142_s27, 4  ;;  %s77_s28 = int_to_ptr.vmem [resolvable:$true] %s76_s28 }
  0x15   :  { %s114_s1 = scalar_lea.vmem %s77_s28, 128  ;;  %p119_p9 = scmp.lt.s32.totalorder %s77_s28, %s77_s28 }
  0x16   :  { %p115_p8 = scmp.ne.s32.totalorder %s77_s28, %s114_s1  ;;  %p120_p10 = scmp.lt.s32.totalorder %s114_s1, %s114_s1 }
  0x18   :  { %p121_p11 = por %p120_p10, %p119_p9 }
  0x1a   :  { %v33_v2 = vld [vmem:[#allocation2] sm:$0xff]  ;;  %p122_p12 = pnand %p121_p11, %p115_p8 }
  0x1b   :  { %v35_v3 = vadd.f32 %v34_v1, %v33_v2 }
  0x1d   :  { %37 = vst.msk [vmem:[#allocation2] sm:$0xff] %vm31_vm0, %v35_v3 }
  0x24   :  { %v41_v4 = vld [vmem:[#allocation2] sm:$0xff] }
  0x25   :  { %v42_v5 = vsel %vm31_vm0, %v41_v4, 0.0 }
  0x26   :  { %43 = vadd.xlane.f32.xlu0 %v42_v5 }
  0xb3   :  { %v44_v7 = vpop.xlane.xlu0 %43 }
  0xb4   :  { %v52_v8 = vsub.f32 %v44_v7, %v85_v6 }
  0xb6   :  { %v53_v9 = vand.u32 2147483647, %v52_v8 }
  0xb8   :  { %v55_v10 = vsel %vm54_vm1, %v53_v9, 0.0 }
  0xb9   :  { %56 = vadd.xlane.f32.xlu0 %v55_v10 }
 0x146   :  { %v57_v12 = vpop.xlane.xlu0 %56 }
 0x147   :  { %v65_v13 = vsub.f32 %v86_v11, %v57_v12 }
 0x149   :  { %v66_v14 = vmul.f32 1.442695, %v65_v13 }
 0x14b   :  { %90 = vpow2.f32 %v66_v14 }
 0x155   :  { %v91_v15 = vpop.eup %90 }
 0x156   :  { %v68_v16 = vmax.f32 %v91_v15, 1.0 }
 0x158   :  { %69 = vst.msk [vmem:[#allocation6] sm:$0xff] %vm54_vm1, %v68_v16 }
 0x159   :  { %125 = shalt.err (!%p122_p12)
}
 0x15a   :  { %s126_s2 = scalar_lea.hbm %s196_s3, 128 }
 0x15b   :  { %p127_p13 = scmp.ne.s32.totalorder %s196_s3, %s126_s2  ;;  %p130_p0 = scmp.lt.u32.totalorder %s126_s2, %s196_s3 }
 0x15d   :  { %p132_p1 = pnand %p130_p0, %p127_p13 }
 0x15f   :  { %135 = shalt.err (!%p132_p1)
}
 0x160   :  { %79 = dma.vmem_to_hbm [thread:$0]  %s77_s28, 128, %s196_s3, [#allocation5]  }
 0x161   :  { %138 = dma.done.wait [#allocation5], 128  }
 0x162   :  { %139 = vsyncadd [#allocation5], 4294967168 }
 0x163   :  { %83 = vsyncpa [#allocation4], 1 }
 0x164   :  { %84 = vsyncpa [#allocation5], 1 }

</bundles_post_ra>
